<compile_context>
chip_gen: v7x
topology: tpu7x:2x2x1
jax: 0.10.0
libtpu: 0.0.40
codegen_flags: <defaults>
</compile_context>

<pallas_src>
import jax
import jax.numpy as jnp
from jax.experimental import pallas as pl
from jax.experimental.pallas import tpu as pltpu


def _round_up(v, m):
    return (v + m - 1) // m * m


def _proj_kernel(x_ref, w_ref, b_ref, o_ref):
    # x_ref: (TM, K_pad) bf16 patches, w_ref: (K_pad, TN) bf16 weights, b_ref: (1, TN) f32
    acc = jnp.dot(x_ref[...], w_ref[...], preferred_element_type=jnp.float32)
    o_ref[...] = (acc + b_ref[...]).astype(o_ref.dtype)


def _select_tiles(M, K_pad, E_pad, out_bytes):
    """Pick (TM, TN) under a double-buffered VMEM budget safe on v5e/v6e/v7x."""
    budget = 24 * 1024 * 1024  # double-buffered working set target
    # Keep the full embedding dim resident whenever the weight block is small enough.
    if 2 * K_pad * E_pad * 2 <= 8 * 1024 * 1024:
        TN = E_pad
    elif E_pad % 512 == 0:
        TN = 512
    elif E_pad % 256 == 0:
        TN = 256
    else:
        TN = 128
    m_cap = _round_up(M, 8)
    TM = 8
    for cand in (2048, 1024, 512, 256, 128, 64, 32, 16, 8):
        cand = min(cand, m_cap)
        ws = 2 * (cand * K_pad * 2       # bf16 activation tile
                  + K_pad * TN * 2       # bf16 weight tile
                  + TN * 4               # f32 bias tile
                  + cand * TN * out_bytes)  # output tile
        if ws <= budget:
            TM = cand
            break
    return TM, TN


def patch_embed_forward(x, weight, bias, patch_size, out_dtype=None):
    """x: (B, C, H, W), weight: (E, C, ph, pw), bias: (E,). Returns ((B, Np, E), Hp, Wp)."""
    B, C, H, W = x.shape
    ph, pw = patch_size
    E = weight.shape[0]
    Hp, Wp = H // ph, W // pw
    Np = Hp * Wp
    K = C * ph * pw
    M = B * Np
    out_dtype = x.dtype if out_dtype is None else out_dtype
    out_bytes = jnp.dtype(out_dtype).itemsize

    # --- patch extraction (matches conv's (c, kh, kw) flattening order) ---
    # Cast to bf16 first so the gather pass moves half the bytes.
    xp = x.astype(jnp.bfloat16).reshape(B, C, Hp, ph, Wp, pw)
    xp = jnp.transpose(xp, (0, 2, 4, 1, 3, 5)).reshape(M, K)        # (M, K) bf16
    w2d = weight.astype(jnp.bfloat16).reshape(E, K).T               # (K, E) bf16
    b2d = bias.astype(jnp.float32).reshape(1, E)                    # (1, E) f32

    # --- pad only the axes that actually need 128-alignment (no-op for ViT shapes) ---
    K_pad = _round_up(K, 128)
    E_pad = _round_up(E, 128)
    if K_pad != K:
        xp = jnp.pad(xp, ((0, 0), (0, K_pad - K)))
        w2d = jnp.pad(w2d, ((0, K_pad - K), (0, 0)))
    if E_pad != E:
        w2d = jnp.pad(w2d, ((0, 0), (0, E_pad - E)))
        b2d = jnp.pad(b2d, ((0, 0), (0, E_pad - E)))

    TM, TN = _select_tiles(M, K_pad, E_pad, out_bytes)
    gm = pl.cdiv(M, TM)          # no M round-up: final partial block is edge-masked
    ne = E_pad // TN
    flops = 2 * M * K_pad * E_pad

    if ne == 1:
        # Weights/bias resident across the whole (1-D) grid -> fetched once.
        grid = (gm,)
        in_specs = [
            pl.BlockSpec((TM, K_pad), lambda i: (i, 0)),
            pl.BlockSpec((K_pad, TN), lambda i: (0, 0)),
            pl.BlockSpec((1, TN), lambda i: (0, 0)),
        ]
        out_specs = pl.BlockSpec((TM, TN), lambda i: (i, 0))
        dim_sem = ("parallel",)
        bytes_accessed = (M * K_pad * 2 + K_pad * E_pad * 2 + E_pad * 4
                          + M * E_pad * out_bytes)
    else:
        # Fallback for very large E: M outer (x tile resident across the inner E axis).
        # Only M is "parallel": splitting E across cores would duplicate activation reads.
        grid = (gm, ne)
        in_specs = [
            pl.BlockSpec((TM, K_pad), lambda i, j: (i, 0)),
            pl.BlockSpec((K_pad, TN), lambda i, j: (0, j)),
            pl.BlockSpec((1, TN), lambda i, j: (0, j)),
        ]
        out_specs = pl.BlockSpec((TM, TN), lambda i, j: (i, j))
        dim_sem = ("parallel", "arbitrary")
        bytes_accessed = (M * K_pad * 2 + gm * K_pad * E_pad * 2 + gm * E_pad * 4
                          + M * E_pad * out_bytes)

    out = pl.pallas_call(
        _proj_kernel,
        out_shape=jax.ShapeDtypeStruct((M, E_pad), out_dtype),
        grid_spec=pltpu.PrefetchScalarGridSpec(
            num_scalar_prefetch=0,
            grid=grid,
            in_specs=in_specs,
            out_specs=out_specs,
        ),
        compiler_params=pltpu.CompilerParams(
            dimension_semantics=dim_sem,
            vmem_limit_bytes=48 * 1024 * 1024),
        cost_estimate=pl.CostEstimate(
            flops=int(flops), transcendentals=0,
            bytes_accessed=int(bytes_accessed)),
    )(xp, w2d, b2d)

    if E_pad != E:
        out = out[:, :E]
    return out.reshape(B, Np, E), Hp, Wp


if __name__ == "__main__":
    # Small shapes consistent with the module: img_size=16, patch_size=4,
    # in_chans=4, embed_dim=32, batch=2.
    B, C, H, W = 2, 4, 16, 16
    ph, pw = 4, 4
    E = 32

    key = jax.random.PRNGKey(0)
    kx, kw, kb = jax.random.split(key, 3)
    x = jax.random.normal(kx, (B, C, H, W), dtype=jnp.float32)
    weight = jax.random.normal(kw, (E, C, ph, pw), dtype=jnp.float32) * 0.02
    bias = jax.random.normal(kb, (E,), dtype=jnp.float32) * 0.02

    fwd = jax.jit(lambda xx, ww, bb: patch_embed_forward(xx, ww, bb, (ph, pw)))
    out, Hp, Wp = fwd(x, weight, bias)
    out = jax.block_until_ready(out)

    # Cross-check against a plain-JAX conv reference (semantic equivalence).
    ref = jax.lax.conv_general_dilated(
        x, weight, window_strides=(ph, pw), padding="VALID",
        dimension_numbers=("NCHW", "OIHW", "NCHW"))
    ref = ref + bias.reshape(1, E, 1, 1)
    ref = ref.reshape(B, E, Hp * Wp).transpose(0, 2, 1)
    assert out.shape == (B, Hp * Wp, E)
    assert int(Hp) == H // ph and int(Wp) == W // pw
    # bf16 MXU inputs with f32 accumulation -> slightly looser tolerance than pure f32.
    assert jnp.allclose(out, ref, atol=2e-2, rtol=2e-2)

    print("KERNEL_OK")
</pallas_src>

<mosaic_0001>
module attributes {stable_mosaic.version = 11 : i64} {
  func.func @_proj_kernel(%arg0: i32, %arg1: memref<32x128xbf16, #tpu.memory_space<vmem>>, %arg2: memref<128x128xbf16, #tpu.memory_space<vmem>>, %arg3: memref<1x128xf32, #tpu.memory_space<vmem>>, %arg4: memref<32x128xf32, #tpu.memory_space<vmem>>) attributes {dimension_semantics = [#tpu.dimension_semantics<parallel>], iteration_bounds = array<i64: 1>, scalar_prefetch = 0 : i64, scratch_operands = 0 : i64, tpu.core_type = #tpu.core_type<tc>, window_params = [{transform_indices = @transform_0, window_bounds = array<i64: 32, 128>}, {pipeline_mode = #tpu.pipeline_mode<synchronous>, transform_indices = @transform_1, window_bounds = array<i64: 128, 128>}, {pipeline_mode = #tpu.pipeline_mode<synchronous>, transform_indices = @transform_2, window_bounds = array<i64: 1, 128>}, {transform_indices = @transform_3, window_bounds = array<i64: 32, 128>}]} {
    %c0 = arith.constant 0 : index
    %c0_0 = arith.constant 0 : index
    %0 = vector.load %arg1[%c0, %c0_0] : memref<32x128xbf16, #tpu.memory_space<vmem>>, vector<32x128xbf16>
    %c0_1 = arith.constant 0 : index
    %c0_2 = arith.constant 0 : index
    %1 = vector.load %arg2[%c0_1, %c0_2] : memref<128x128xbf16, #tpu.memory_space<vmem>>, vector<128x128xbf16>
    %cst = arith.constant dense<0.000000e+00> : vector<32x128xf32>
    %2 = tpu.matmul %0, %1, %cst {dimension_numbers = #tpu.dot_dimension_numbers<[1], [0], [0], [1], [0, 0, 1, 1], [], []>} : vector<32x128xbf16>, vector<128x128xbf16>, vector<32x128xf32> -> vector<32x128xf32>
    %c0_3 = arith.constant 0 : index
    %c0_4 = arith.constant 0 : index
    %3 = vector.load %arg3[%c0_3, %c0_4] : memref<1x128xf32, #tpu.memory_space<vmem>>, vector<1x128xf32>
    %4 = vector.broadcast %3 : vector<1x128xf32> to vector<32x128xf32>
    %5 = arith.addf %2, %4 : vector<32x128xf32>
    %c0_5 = arith.constant 0 : index
    %c0_6 = arith.constant 0 : index
    %6 = vector.load %arg4[%c0_5, %c0_6] : memref<32x128xf32, #tpu.memory_space<vmem>>, vector<32x128xf32>
    tpu.vector_store %arg4[%c0_5, %c0_6], %5 {strides = array<i32>} : memref<32x128xf32, #tpu.memory_space<vmem>>, vector<32x128xf32>,
    return
  }
  func.func @transform_0(%arg0: i32) -> (i32, i32) {
    %c0_i32 = arith.constant 0 : i32
    %c0_i32_0 = arith.constant 0 : i32
    return %arg0, %c0_i32 : i32, i32
  }
  func.func @transform_1(%arg0: i32) -> (i32, i32) {
    %c0_i32 = arith.constant 0 : i32
    %c0_i32_0 = arith.constant 0 : i32
    %c0_i32_1 = arith.constant 0 : i32
    return %c0_i32, %c0_i32_0 : i32, i32
  }
  func.func @transform_2(%arg0: i32) -> (i32, i32) {
    %c0_i32 = arith.constant 0 : i32
    %c0_i32_0 = arith.constant 0 : i32
    %c0_i32_1 = arith.constant 0 : i32
    return %c0_i32, %c0_i32_0 : i32, i32
  }
  func.func @transform_3(%arg0: i32) -> (i32, i32) {
    %c0_i32 = arith.constant 0 : i32
    %c0_i32_0 = arith.constant 0 : i32
    return %arg0, %c0_i32 : i32, i32
  }
}

</mosaic_0001>

<bundles_post_ra>
// kernel: _lambda_.1
= control target key start
LH: loop header
LB: loop body
LE: loop exit
PB: predicated region body
PF: predicated region fallthrough
CT: control target
= control target key end

     0   :  { %s318_s0 = inlined_call_operand.vmem [shape: bf16[32,128], index: 0, kind: input, shape index: {}]   ;;  %s319_s1 = inlined_call_operand.vmem [shape: bf16[128,128], index: 1, kind: input, shape index: {}]   ;;  %s320_s2 = inlined_call_operand.vmem [shape: f32[1,128], index: 2, kind: input, shape index: {}]   ;;  %s321_s3 = inlined_call_operand.hbm [shape: f32[32,128], index: 3, kind: output, shape index: {}]  }
   0x1   :  { %v216_v0 = vld [vmem:[%s319_s1] sm:$0xff]   ;;  %v217_v1 = vld [vmem:[%s319_s1 + $0x8] sm:$0xff]   ;;  %v218_v2 = vld [vmem:[%s319_s1 + $0x10] sm:$0xff]  }
   0x2   :  { %193 = vmatprep.subr.bf16.mxu0 %v216_v0  ;;  %v219_v3 = vld [vmem:[%s319_s1 + $0x18] sm:$0xff]   ;;  %v224_v4 = vld [vmem:[%s318_s0] sm:$0xff]  }
   0x3   :  { %194 = vmatpush3.bf16.msra.mxu0 %v216_v0  ;;  %209 = vmatprep.mubr.bf16.mxu0 %v224_v4 }
   0x4   :  { %195 = vmatprep.subr.bf16.mxu0 %v217_v1 }
   0x7   :  { %196 = vmatpush3.bf16.msra.mxu0 %v217_v1 }
   0x8   :  { %197 = vmatprep.subr.bf16.mxu0 %v218_v2 }
   0x9   :  { %8 = vsyncpa [#allocation3], 0  ;;  %v220_v5 = vld [vmem:[%s319_s1 + $0x20] sm:$0xff]   ;;  %v221_v6 = vld [vmem:[%s319_s1 + $0x28] sm:$0xff]   ;;  %s250_s7 = smov [#allocation2]  }
   0xa   :  { %v222_v7 = vld [vmem:[%s319_s1 + $0x30] sm:$0xff]   ;;  %v223_v8 = vld [vmem:[%s319_s1 + $0x38] sm:$0xff]   ;;  %v225_v9 = vld [vmem:[%s318_s0 + $0x8] sm:$0xff]   ;;  %s161_s8 = sshll.u32 %s250_s7, 4  ;;  %s162_s8 = int_to_ptr.vmem [resolvable:$true] %s161_s8 }
   0xb   :  { %198 = vmatpush3.bf16.msra.mxu0 %v218_v2  ;;  %v172_v10 = vld [vmem:[%s320_s2] ss:$0 sm:$0xff]  ;;  %s226_s0 = scalar_lea.vmem %s162_s8, 512  ;;  %p231_p1 = scmp.lt.s32.totalorder %s162_s8, %s162_s8 }
   0xc   :  { %199 = vmatprep.subr.bf16.mxu0 %v219_v3  ;;  %p227_p0 = scmp.ne.s32.totalorder %s162_s8, %s226_s0  ;;  %p232_p2 = scmp.lt.s32.totalorder %s226_s0, %s226_s0 }
   0xe   :  { %p233_p3 = por %p232_p2, %p231_p1 }
   0xf   :  { %200 = vmatpush3.bf16.msra.mxu0 %v219_v3 }
  0x10   :  { %201 = vmatprep.subr.bf16.mxu0 %v220_v5  ;;  %p234_p4 = pnand %p233_p3, %p227_p0 }
  0x13   :  { %202 = vmatpush3.bf16.msra.mxu0 %v220_v5 }
  0x14   :  { %203 = vmatprep.subr.bf16.mxu0 %v221_v6 }
  0x17   :  { %204 = vmatpush3.bf16.msra.mxu0 %v221_v6 }
  0x18   :  { %205 = vmatprep.subr.bf16.mxu0 %v222_v7 }
  0x1b   :  { %206 = vmatpush3.bf16.msra.mxu0 %v222_v7 }
  0x1c   :  { %207 = vmatprep.subr.bf16.mxu0 %v223_v8 }
  0x1f   :  { %208 = vmatpush3.bf16.msra.mxu0 %v223_v8 }
  0x22   :  { %210 = vmatmul.mubr.bf16.vlgmr.msra.gmra.mrb[0].mxu0 %v225_v9 }
  0xf5   :  { %v211_v11 = vpop.f32.mrb[0].mxu0 }
  0xf6   :  { %v146_v12 = vadd.f32 %v211_v11, %v172_v10  ;;  %v137_v13 = vpop.f32.mrb[1].mxu0 }
  0xf7   :  { %v138_v14 = vadd.f32 %v172_v10, %v137_v13  ;;  %v212_v15 = vpop.f32.mrb[2].mxu0 }
  0xf8   :  { %154 = vst [vmem:[#allocation2 + $0x10] sm:$0xff] %v146_v12  ;;  %v149_v16 = vadd.f32 %v212_v15, %v172_v10  ;;  %v140_v17 = vpop.f32.mrb[3].mxu0 }
  0xf9   :  { %152 = vst [vmem:[#allocation2] sm:$0xff] %v138_v14  ;;  %v141_v18 = vadd.f32 %v172_v10, %v140_v17 }
  0xfa   :  { %155 = vst [vmem:[#allocation2 + $0x18] sm:$0xff] %v149_v16 }
  0xfb   :  { %153 = vst [vmem:[#allocation2 + $0x8] sm:$0xff] %v141_v18 }
  0xfc   :  { %237 = shalt.err (!%p234_p4)
}
  0xfd   :  { %s238_s9 = scalar_lea.hbm %s321_s3, 512 }
  0xfe   :  { %p239_p5 = scmp.ne.s32.totalorder %s321_s3, %s238_s9  ;;  %p242_p6 = scmp.lt.u32.totalorder %s238_s9, %s321_s3 }
 0x100   :  { %p244_p7 = pnand %p242_p6, %p239_p5 }
 0x102   :  { %247 = shalt.err (!%p244_p7)
}
 0x103   :  { %s251_s14 = smov 128   ;;  %s252_s15 = smov 8  }
 0x104   :  { %167 = dma.vmem_to_hbm [thread:$0]  %s162_s8, 512, %s321_s3, [#allocation3], %s251_s14, %s251_s14, %s252_s15  }
 0x105   :  { %248 = dma.done.wait [#allocation3], 512  }
 0x106   :  { %249 = vsyncadd [#allocation3], 4294966784 }
 0x107   :  { %171 = vsyncpa [#allocation3], 1 }

</bundles_post_ra>
